<compile_context>
chip_gen: v5e
topology: v5e:2x2
jax: 0.10.0
libtpu: 0.0.40
codegen_flags: <defaults>
</compile_context>

<pallas_src>
import functools

import jax
import jax.numpy as jnp
from jax.experimental import pallas as pl
from jax.experimental.pallas import tpu as pltpu

# The reference argparse never defines --loss_with_logits; default to the numerically
# stable with-logits branch (set False for the plain-BCE-on-probabilities branch).
LOSS_WITH_LOGITS = True


def _tpu_hw_params():
    """(vmem_capacity_bytes, tensorcores_per_chip). Defensive: safe fallbacks if queries fail."""
    vmem_cap = None
    try:
        info = pltpu.get_tpu_info()
        vmem_cap = getattr(info, "vmem_capacity_bytes", None)
    except Exception:
        pass
    kind = ""
    try:
        kind = (jax.devices()[0].device_kind or "").lower()
    except Exception:
        pass
    is_v7 = "v7" in kind
    if vmem_cap is None or not isinstance(vmem_cap, int) or vmem_cap <= 0:
        vmem_cap = (64 << 20) if is_v7 else (128 << 20)
    num_tc = 2 if is_v7 else 1
    return vmem_cap, num_tc, is_v7


def _ovabce_kernel(out_ref, inds_ref, loss_ref, acc_ref, *, tile_c, k_inds, with_logits):
    """Per (chunk, row-tile, C-tile) step: OR-mask targets, BCE, VALU-accumulate partial sums."""
    i = pl.program_id(1)            # row-tile within chunk      (reduction axis)
    j = pl.program_id(2)            # C-tile                     (reduction axis)
    last_i = pl.num_programs(1) - 1
    last_j = pl.num_programs(2) - 1

    @pl.when(jnp.logical_and(i == 0, j == 0))
    def _():
        acc_ref[...] = jnp.zeros_like(acc_ref)

    x = out_ref[...].astype(jnp.float32)                               # (tile_n, tile_c)

    # Shift the C-tile offset onto the tiny (tile_n, K) indices (free) instead of the full-shape iota.
    inds_local = inds_ref[...] - j * tile_c                            # (tile_n, K) int32
    iota = jax.lax.broadcasted_iota(jnp.int32, x.shape, 1)             # raw local column ids

    # t[i, c] = any_k (inds[i, k] == c); duplicates / out-of-range(-1) handled by the OR.
    mask = iota == inds_local[:, 0:1]
    for kk in range(1, k_inds):
        mask = jnp.logical_or(mask, iota == inds_local[:, kk:kk + 1])

    if with_logits:
        # BCEWithLogitsLoss: max(x,0) - x*t + log1p(exp(-|x|))  ==  max(±x, 0) + log1p(exp(-|x|))
        # with the sign flipped where t == 1. One fewer VALU op/element than base - x.
        z = jnp.where(mask, -x, x)
        per = jnp.maximum(z, 0.0) + jnp.log1p(jnp.exp(-jnp.abs(x)))    # EUP exp/log1p, VALU rest
    else:
        # BCELoss on probabilities; PyTorch clamps log at -100. Select the probability first so only
        # ONE log per element hits the (single-slot) EUP.
        p_sel = jnp.where(mask, x, 1.0 - x)
        per = -jnp.maximum(jnp.log(p_sel), -100.0)

    # Fold the tile_c lanes down to 128 with pure VALU adds (vregs at identical lane positions),
    # then accumulate into the lane-shaped VMEM accumulator.
    partial = per[:, 0:128]
    for s in range(1, tile_c // 128):
        partial = partial + per[:, s * 128:(s + 1) * 128]
    acc_ref[...] += partial

    # Finalize this chunk: one sublane reduce to a (1,128) lane-dense output block.
    @pl.when(jnp.logical_and(i == last_i, j == last_j))
    def _():
        loss_ref[...] = jnp.sum(acc_ref[...], axis=0, keepdims=True)


def ovabce_loss(out, inds, *, tile_n=None, tile_c=None, num_chunks=None,
                with_logits=LOSS_WITH_LOGITS):
    """out: (N, C) float32/bfloat16 logits (or probs). inds: (N, K) ints in [0, C]. Returns scalar mean BCE.

    bf16 logits are consumed as-is (upcast happens in-kernel) so HBM traffic is halved on v5e/v6e.
    """
    n, c = out.shape
    _, k = inds.shape

    vmem_cap, num_tc, is_v7 = _tpu_hw_params()

    # Indices >= C land in the dropped last target column -> treat as "no class".
    inds = jnp.where(inds.astype(jnp.int32) >= c, jnp.int32(-1), inds.astype(jnp.int32))

    itemsize = jnp.dtype(out.dtype).itemsize
    # Packed dtypes (bf16/fp16) pack 16 rows per sublane group -> use 16-row granularity there.
    row_align = 16 if itemsize < 4 else 8

    # Pad rows / columns with loss-neutral values (per-element contribution exactly 0 there);
    # the mean divisor stays the original N*C.
    pad_val = -1e4 if with_logits else 0.0
    n_pad = ((n + row_align - 1) // row_align) * row_align
    c_pad = ((c + 127) // 128) * 128
    if (n_pad, c_pad) != (n, c):
        out = jnp.pad(out, ((0, n_pad - n), (0, c_pad - c)), constant_values=pad_val)
        inds = jnp.pad(inds, ((0, n_pad - n), (0, 0)), constant_values=-1)

    # ---- tile_c: keep blocks lane-dense (multiple of 128) and VMEM-friendly for large C ----
    if tile_c is None:
        tile_c = c_pad
        max_lanes = 2048
        if tile_c > max_lanes:
            tc = max_lanes
            while c_pad % tc:
                tc -= 128
            tile_c = tc
    assert c_pad % tile_c == 0 and tile_c % 128 == 0

    # ---- tile_n: large row tiles, budgeted per logits block (8 MiB, 6 MiB on v7x's 64 MiB VMEM) ----
    block_budget = (6 << 20) if is_v7 else (8 << 20)
    if tile_n is None:
        vmem_rows = max(row_align, block_budget // (tile_c * itemsize))
        tile_n = min(n_pad, 4096, vmem_rows)
    tile_n = max(row_align, (int(tile_n) // row_align) * row_align)
    while n_pad % tile_n:
        tile_n -= row_align
    row_tiles = n_pad // tile_n

    # ---- outer "parallel" chunks: one per TensorCore. Single-TC chips (v5e/v6e) skip the axis. ----
    if num_chunks is None:
        if num_tc >= 2:
            # Keep row_tiles even so both TCs get work; shrink tile_n if necessary.
            tn = tile_n
            while tn >= row_align and (n_pad % tn or (n_pad // tn) % 2):
                tn -= row_align
            if tn >= row_align:
                tile_n = tn
                row_tiles = n_pad // tile_n
                num_chunks = 2
            else:
                num_chunks = 1
        else:
            num_chunks = 1
    else:
        num_chunks = max(1, int(num_chunks))
        while row_tiles % num_chunks:   # graceful clamp instead of assert
            num_chunks -= 1
    inner = row_tiles // num_chunks
    c_tiles = c_pad // tile_c

    # ---- VMEM budget: logits + inds double-buffered, accumulator, output block ----
    need = (2 * tile_n * tile_c * itemsize     # logits blocks (double-buffered)
            + 2 * tile_n * 128 * 4             # inds blocks (lane-padded, double-buffered)
            + tile_n * 128 * 4                 # accumulator scratch
            + 2 * 8 * 128 * 4)                 # output block
    hw_cap = (vmem_cap * 3) // 4               # ~48 MiB on v7x, ~96 MiB on v5e/v6e
    vmem_limit = int(min(hw_cap, max(need + (8 << 20), 32 << 20)))

    # Advisory cost hint so XLA overlaps the surrounding model matmul / final reduce correctly.
    cost = pl.CostEstimate(
        flops=6 * n_pad * c_pad,
        transcendentals=(2 if with_logits else 1) * n_pad * c_pad,
        bytes_accessed=n_pad * c_pad * itemsize + n_pad * k * 4 + num_chunks * 128 * 4)

    kernel = functools.partial(
        _ovabce_kernel, tile_c=tile_c, k_inds=k, with_logits=with_logits)

    partials = pl.pallas_call(
        kernel,
        out_shape=jax.ShapeDtypeStruct((1, num_chunks * 128), jnp.float32),
        grid_spec=pltpu.PrefetchScalarGridSpec(
            num_scalar_prefetch=0,
            grid=(num_chunks, inner, c_tiles),
            in_specs=[
                pl.BlockSpec((tile_n, tile_c), lambda p, i, j: (p * inner + i, j)),
                # Block index constant across the innermost j axis -> pipeline should skip re-DMA.
                # TODO(synk): confirm in the Mosaic dump that the inds block isn't re-fetched per C-tile.
                pl.BlockSpec((tile_n, k), lambda p, i, j: (p * inner + i, 0)),
            ],
            out_specs=pl.BlockSpec((1, 128), lambda p, i, j: (0, p)),
            scratch_shapes=[pltpu.VMEM((tile_n, 128), jnp.float32)],
        ),
        compiler_params=pltpu.CompilerParams(
            dimension_semantics=("parallel", "arbitrary", "arbitrary"),
            vmem_limit_bytes=vmem_limit),
        cost_estimate=cost,
    )(out, inds)

    # Final 128*num_chunks-element reduction + mean (original, unpadded denominator) in plain JAX.
    return jnp.sum(partials) / jnp.float32(n * c)


def _reference_loss(out, inds, with_logits=LOSS_WITH_LOGITS):
    """Pure-JAX reference matching the PyTorch semantics."""
    n, c = out.shape
    tgt = jnp.zeros((n, c + 1), jnp.float32)
    tgt = jax.vmap(lambda row, idx: row.at[idx].set(1.0))(tgt, inds)
    tgt = tgt[:, :-1]
    x = out.astype(jnp.float32)
    if with_logits:
        per = jnp.maximum(x, 0.0) - x * tgt + jnp.log1p(jnp.exp(-jnp.abs(x)))
    else:
        per = -(tgt * jnp.maximum(jnp.log(x), -100.0)
                + (1.0 - tgt) * jnp.maximum(jnp.log(1.0 - x), -100.0))
    return jnp.mean(per)


if __name__ == "__main__":
    key = jax.random.PRNGKey(0)
    k_x, k_w, k_i = jax.random.split(key, 3)

    # Small synthetic setup: batch N=16, feature dim D=32, classes C=128, K=3 labels/row.
    N, D, C, K = 16, 32, 128, 3

    # Tiny deterministic "model": a linear layer producing (N, C) logits (plain-JAX glue).
    x = jax.random.normal(k_x, (N, D), jnp.float32)
    w = jax.random.normal(k_w, (D, C), jnp.float32) * 0.1
    out = x @ w                                                   # (N, C) logits

    # Indices in [0, C]; index == C scatters into the dropped last column (no-op class).
    inds = jax.random.randint(k_i, (N, K), 0, C + 1, jnp.int32)   # (N, K)

    loss = ovabce_loss(out, inds)
    jax.block_until_ready(loss)
    ref = _reference_loss(out, inds)
    assert jnp.allclose(loss, ref, rtol=1e-5, atol=1e-5), (loss, ref)

    # Padding path with cifar10-like shapes (C=10, odd N).
    N2, C2, K2 = 10, 10, 2
    out2 = jax.random.normal(jax.random.PRNGKey(1), (N2, C2), jnp.float32)
    inds2 = jax.random.randint(jax.random.PRNGKey(2), (N2, K2), 0, C2 + 1, jnp.int32)
    loss2 = ovabce_loss(out2, inds2)
    jax.block_until_ready(loss2)
    ref2 = _reference_loss(out2, inds2)
    assert jnp.allclose(loss2, ref2, rtol=1e-5, atol=1e-5), (loss2, ref2)

    # bf16 logits fed end-to-end (halves HBM bytes; upcast happens in-kernel).
    N3, C3, K3 = 64, 256, 4
    out3 = (jax.random.normal(jax.random.PRNGKey(3), (N3, C3), jnp.float32)).astype(jnp.bfloat16)
    inds3 = jax.random.randint(jax.random.PRNGKey(4), (N3, K3), 0, C3 + 1, jnp.int32)
    loss3 = ovabce_loss(out3, inds3)
    jax.block_until_ready(loss3)
    ref3 = _reference_loss(out3.astype(jnp.float32), inds3)
    assert jnp.allclose(loss3, ref3, rtol=1e-5, atol=1e-5), (loss3, ref3)

    # Non-logits branch (plain BCE on probabilities), single log per element in-kernel.
    probs = jax.nn.sigmoid(out)
    loss4 = ovabce_loss(probs, inds, with_logits=False)
    jax.block_until_ready(loss4)
    ref4 = _reference_loss(probs, inds, with_logits=False)
    assert jnp.allclose(loss4, ref4, rtol=1e-5, atol=1e-5), (loss4, ref4)

    print("KERNEL_OK")
</pallas_src>

<mosaic_0001>
module attributes {stable_mosaic.version = 11 : i64} {
  func.func @_ovabce_kernel(%arg0: i32, %arg1: i32, %arg2: i32, %arg3: memref<16x128xf32, #tpu.memory_space<vmem>>, %arg4: memref<16x3xi32, #tpu.memory_space<vmem>>, %arg5: memref<1x128xf32, #tpu.memory_space<vmem>>, %arg6: memref<16x128xf32, #tpu.memory_space<vmem>>) attributes {dimension_semantics = [#tpu.dimension_semantics<parallel>, #tpu.dimension_semantics<arbitrary>, #tpu.dimension_semantics<arbitrary>], iteration_bounds = array<i64: 1, 1, 1>, scalar_prefetch = 0 : i64, scratch_operands = 1 : i64, tpu.core_type = #tpu.core_type<tc>, window_params = [{transform_indices = @transform_0, window_bounds = array<i64: 16, 128>}, {transform_indices = @transform_1, window_bounds = array<i64: 16, 3>}, {transform_indices = @transform_2, window_bounds = array<i64: 1, 128>}]} {
    %c0_i32 = arith.constant 0 : i32
    %0 = arith.cmpi eq, %arg1, %c0_i32 : i32
    %c0_i32_0 = arith.constant 0 : i32
    %1 = arith.cmpi eq, %arg2, %c0_i32_0 : i32
    %2 = arith.andi %0, %1 : i1
    %3 = arith.extui %2 : i1 to i32
    %c0_i32_1 = arith.constant 0 : i32
    %4 = arith.cmpi ne, %3, %c0_i32_1 : i32
    scf.if %4 {
      %cst_14 = arith.constant 0.000000e+00 : f32
      %41 = vector.broadcast %cst_14 : f32 to vector<16x128xf32>
      %c0_15 = arith.constant 0 : index
      %c0_16 = arith.constant 0 : index
      %42 = vector.load %arg6[%c0_15, %c0_16] : memref<16x128xf32, #tpu.memory_space<vmem>>, vector<16x128xf32>
      tpu.vector_store %arg6[%c0_15, %c0_16], %41 {strides = array<i32>} : memref<16x128xf32, #tpu.memory_space<vmem>>, vector<16x128xf32>,
    } else {
    }
    %c0 = arith.constant 0 : index
    %c0_2 = arith.constant 0 : index
    %5 = vector.load %arg3[%c0, %c0_2] : memref<16x128xf32, #tpu.memory_space<vmem>>, vector<16x128xf32>
    %c0_3 = arith.constant 0 : index
    %c0_4 = arith.constant 0 : index
    %6 = vector.load %arg4[%c0_3, %c0_4] : memref<16x3xi32, #tpu.memory_space<vmem>>, vector<16x3xi32>
    %c128_i32 = arith.constant 128 : i32
    %7 = arith.muli %arg2, %c128_i32 : i32
    %8 = vector.broadcast %7 : i32 to vector<16x3xi32>
    %9 = arith.subi %6, %8 : vector<16x3xi32>
    %10 = tpu.iota {dimensions = array<i32: 1>} : vector<16x128xi32>
    %11 = vector.extract_strided_slice %9 {offsets = [0, 0], sizes = [16, 1], strides = [1, 1]} : vector<16x3xi32> to vector<16x1xi32>
    %12 = vector.broadcast %11 : vector<16x1xi32> to vector<16x128xi32>
    %13 = arith.cmpi eq, %10, %12 : vector<16x128xi32>
    %14 = vector.extract_strided_slice %9 {offsets = [0, 1], sizes = [16, 1], strides = [1, 1]} : vector<16x3xi32> to vector<16x1xi32>
    %15 = vector.broadcast %14 : vector<16x1xi32> to vector<16x128xi32>
    %16 = arith.cmpi eq, %10, %15 : vector<16x128xi32>
    %17 = arith.ori %13, %16 : vector<16x128xi1>
    %18 = vector.extract_strided_slice %9 {offsets = [0, 2], sizes = [16, 1], strides = [1, 1]} : vector<16x3xi32> to vector<16x1xi32>
    %19 = vector.broadcast %18 : vector<16x1xi32> to vector<16x128xi32>
    %20 = arith.cmpi eq, %10, %19 : vector<16x128xi32>
    %21 = arith.ori %17, %20 : vector<16x128xi1>
    %cst = arith.constant 0.000000e+00 : f32
    %22 = vector.broadcast %cst : f32 to vector<16x128xf32>
    %23 = arith.subf %22, %5 : vector<16x128xf32>
    %24 = arith.select %21, %23, %5 : vector<16x128xi1>, vector<16x128xf32>
    %cst_5 = arith.constant 0.000000e+00 : f32
    %25 = vector.broadcast %cst_5 : f32 to vector<16x128xf32>
    %26 = arith.maximumf %24, %25 : vector<16x128xf32>
    %27 = math.absf %5 : vector<16x128xf32>
    %cst_6 = arith.constant 0.000000e+00 : f32
    %28 = vector.broadcast %cst_6 : f32 to vector<16x128xf32>
    %29 = arith.subf %28, %27 : vector<16x128xf32>
    %30 = math.exp %29 : vector<16x128xf32>
    %31 = math.log1p %30 : vector<16x128xf32>
    %32 = arith.addf %26, %31 : vector<16x128xf32>
    %c0_7 = arith.constant 0 : index
    %c0_8 = arith.constant 0 : index
    %33 = vector.load %arg6[%c0_7, %c0_8] : memref<16x128xf32, #tpu.memory_space<vmem>>, vector<16x128xf32>
    %34 = arith.addf %33, %32 : vector<16x128xf32>
    %c0_9 = arith.constant 0 : index
    %c0_10 = arith.constant 0 : index
    %35 = vector.load %arg6[%c0_9, %c0_10] : memref<16x128xf32, #tpu.memory_space<vmem>>, vector<16x128xf32>
    tpu.vector_store %arg6[%c0_9, %c0_10], %34 {strides = array<i32>} : memref<16x128xf32, #tpu.memory_space<vmem>>, vector<16x128xf32>,
    %c0_i32_11 = arith.constant 0 : i32
    %36 = arith.cmpi eq, %arg1, %c0_i32_11 : i32
    %c0_i32_12 = arith.constant 0 : i32
    %37 = arith.cmpi eq, %arg2, %c0_i32_12 : i32
    %38 = arith.andi %36, %37 : i1
    %39 = arith.extui %38 : i1 to i32
    %c0_i32_13 = arith.constant 0 : i32
    %40 = arith.cmpi ne, %39, %c0_i32_13 : i32
    scf.if %40 {
      %c0_14 = arith.constant 0 : index
      %c0_15 = arith.constant 0 : index
      %41 = vector.load %arg6[%c0_14, %c0_15] : memref<16x128xf32, #tpu.memory_space<vmem>>, vector<16x128xf32>
      %cst_16 = arith.constant dense<0.000000e+00> : vector<128xf32>
      %42 = vector.multi_reduction <add>, %41, %cst_16 [0] : vector<16x128xf32> to vector<128xf32>
      %43 = vector.shape_cast %42 : vector<128xf32> to vector<1x128xf32>
      %c0_17 = arith.constant 0 : index
      %c0_18 = arith.constant 0 : index
      %44 = vector.load %arg5[%c0_17, %c0_18] : memref<1x128xf32, #tpu.memory_space<vmem>>, vector<1x128xf32>
      tpu.vector_store %arg5[%c0_17, %c0_18], %43 {strides = array<i32>} : memref<1x128xf32, #tpu.memory_space<vmem>>, vector<1x128xf32>,
    } else {
    }
    return
  }
  func.func @transform_0(%arg0: i32, %arg1: i32, %arg2: i32) -> (i32, i32) {
    %c1_i32 = arith.constant 1 : i32
    %0 = arith.muli %arg0, %c1_i32 : i32
    %1 = arith.addi %0, %arg1 : i32
    %c0_i32 = arith.constant 0 : i32
    return %1, %arg2 : i32, i32
  }
  func.func @transform_1(%arg0: i32, %arg1: i32, %arg2: i32) -> (i32, i32) {
    %c1_i32 = arith.constant 1 : i32
    %0 = arith.muli %arg0, %c1_i32 : i32
    %1 = arith.addi %0, %arg1 : i32
    %c0_i32 = arith.constant 0 : i32
    %c0_i32_0 = arith.constant 0 : i32
    return %1, %c0_i32 : i32, i32
  }
  func.func @transform_2(%arg0: i32, %arg1: i32, %arg2: i32) -> (i32, i32) {
    %c0_i32 = arith.constant 0 : i32
    %c0_i32_0 = arith.constant 0 : i32
    return %c0_i32, %arg0 : i32, i32
  }
}

</mosaic_0001>

<bundles_post_ra>
// kernel: tpu_custom_call.1
= control target key start
LH: loop header
LB: loop body
LE: loop exit
PB: predicated region body
PF: predicated region fallthrough
CT: control target
= control target key end

     0   :  { %v224_v1 = vmov 1   ;;  %v225_v2 = vmov 0   ;;  %s258_s0 = inlined_call_operand.vmem [shape: f32[16,128], index: 0, kind: input, shape index: {}]   ;;  %s259_s1 = inlined_call_operand.vmem [shape: s32[16,3], index: 1, kind: input, shape index: {}]   ;;  %s260_s2 = inlined_call_operand.hbm [shape: f32[1,128], index: 2, kind: output, shape index: {}]  }
   0x1   :  { %v66_v0 = vld [vmem:[%s259_s1] sm:$0xff]  ;;  %187 = vset.pattern.permute.xlu1 %v224_v1  ;;  %186 = vset.pattern.permute.xlu0 %v225_v2 }
   0x2   :  { %7 = vsyncpa [#allocation4], 0  ;;  %83 = vperm.xlu1 %187, %v66_v0   ;;  %75 = vperm.xlu0 %186, %v66_v0   ;;  %v226_v3 = vmov 2   ;;  %v67_v4 = vld [vmem:[%s259_s1 + $0x8] sm:$0xff]  ;;  %v64_v5 = vld [vmem:[%s258_s0] sm:$0xff]  ;;  %v72_v15 = vlaneseq  ;;  %s161_s19 = sshll.u32 %s260_s2, 4  ;;  %s162_s19 = int_to_ptr.hbm [resolvable:$true] %s161_s19 }
   0x3   :  { %188 = vset.pattern.permute.xlu2 %v226_v3  ;;  %v65_v6 = vld [vmem:[%s258_s0 + $0x8] sm:$0xff]  ;;  %v108_v7 = vand.u32 2147483647, %v64_v5  ;;  %v102_v26 = vsub.f32 0.0, %v64_v5  ;;  %s227_s0 = smov [#allocation3]  }
   0x4   :  { %93 = vperm.xlu2 %188, %v66_v0   ;;  %v109_v8 = vand.u32 2147483647, %v65_v6  ;;  %v73_v18 = vand.u32 127, %v72_v15  ;;  %v103_v37 = vsub.f32 0.0, %v65_v6  ;;  %s159_s1 = sshll.u32 %s227_s0, 4  ;;  %s160_s1 = int_to_ptr.vmem [resolvable:$true] %s159_s1 }
   0x5   :  { %v110_v9 = vsub.f32 0.0, %v108_v7 }
   0x6   :  { %v111_v10 = vsub.f32 0.0, %v109_v8 }
   0x7   :  { %v112_v11 = vmul.f32 1.442695, %v110_v9 }
   0x8   :  { %v114_v12 = vmul.f32 1.442695, %v111_v10 }
   0x9   :  { %190 = vpow2.f32 %v112_v11 }
   0xa   :  { %86 = vperm.xlu1 %187, %v67_v4   ;;  %78 = vperm.xlu0 %186, %v67_v4   ;;  %192 = vpow2.f32 %v114_v12 }
   0xc   :  { %96 = vperm.xlu2 %188, %v67_v4  }
   0xf   :  { %v191_v13 = vpop.eup %190 }
  0x10   :  { %v193_v14 = vpop.eup %192  ;;  %v116_v16 = vadd.f32 1.0, %v191_v13  ;;  %v119_v20 = vmul.f32 -0.5, %v191_v13  ;;  %v122_v29 = vand.u32 2147483647, %v191_v13 }
  0x11   :  { %v125_v17 = vadd.f32 1.0, %v193_v14  ;;  %v128_v23 = vmul.f32 -0.5, %v193_v14  ;;  %v131_v30 = vand.u32 2147483647, %v193_v14 }
  0x12   :  { %189 = vset.pattern.permute.xlu0 %v226_v3  ;;  %194 = vlog2.f32 %v116_v16  ;;  %v120_v24 = vadd.f32 1.0, %v119_v20  ;;  %vm123_vm5 = vcmp.lt.f32.partialorder %v122_v29, 0.0004427343 }
  0x13   :  { %196 = vlog2.f32 %v125_v17  ;;  %v129_v27 = vadd.f32 1.0, %v128_v23  ;;  %vm132_vm8 = vcmp.lt.f32.partialorder %v131_v30, 0.0004427343 }
  0x14   :  { %v121_v32 = vmul.f32 %v191_v13, %v120_v24 }
  0x15   :  { %v130_v39 = vmul.f32 %v193_v14, %v129_v27 }
  0x18   :  { %v195_v25 = vpop.eup %194 }
  0x19   :  { %v197_v28 = vpop.eup %196  ;;  %v118_v31 = vmul.f32 0.6931472, %v195_v25 }
  0x1a   :  { %v127_v38 = vmul.f32 0.6931472, %v197_v28 }
  0x1b   :  { %v124_v41 = vsel %vm123_vm5, %v121_v32, %v118_v31 }
  0x1c   :  { %v133_v43 = vsel %vm132_vm8, %v130_v39, %v127_v38 }
  0x5e   :  { %v94_v19 = vpop.permute.xlu2 %93 }
  0x5f   :  { %vm98_vm2 = vcmp.eq.s32.totalorder %v73_v18, %v94_v19 }
  0x66   :  { %v97_v33 = vpop.permute.xlu2 %96 }
  0x67   :  { %vm99_vm9 = vcmp.eq.s32.totalorder %v73_v18, %v97_v33 }
  0x74   :  { %v84_v21 = vpop.permute.xlu1 %83  ;;  %v76_v22 = vpop.permute.xlu0 %75 }
  0x75   :  { %vm88_vm0 = vcmp.eq.s32.totalorder %v73_v18, %v84_v21  ;;  %vm80_vm1 = vcmp.eq.s32.totalorder %v73_v18, %v76_v22 }
  0x76   :  { %vm90_vm3 = vmor %vm80_vm1, %vm88_vm0 }
  0x77   :  { %vm100_vm4 = vmor %vm90_vm3, %vm98_vm2 }
  0x78   :  { %v104_v34 = vsel %vm100_vm4, %v102_v26, %v64_v5 }
  0x79   :  { %v106_v40 = vmax.f32 %v104_v34, 0.0 }
  0x7b   :  { %v134_v45 = vadd.f32 %v124_v41, %v106_v40 }
  0x7c   :  { %v87_v35 = vpop.permute.xlu1 %86  ;;  %v79_v36 = vpop.permute.xlu0 %78 }
  0x7d   :  { %vm89_vm6 = vcmp.eq.s32.totalorder %v73_v18, %v87_v35  ;;  %vm81_vm7 = vcmp.eq.s32.totalorder %v73_v18, %v79_v36 }
  0x7e   :  { %vm91_vm10 = vmor %vm81_vm7, %vm89_vm6 }
  0x7f   :  { %vm101_vm11 = vmor %vm91_vm10, %vm99_vm9 }
  0x80   :  { %v105_v42 = vsel %vm101_vm11, %v103_v37, %v65_v6 }
  0x81   :  { %v107_v44 = vmax.f32 %v105_v42, 0.0 }
  0x83   :  { %v135_v46 = vadd.f32 %v133_v43, %v107_v44 }
  0x85   :  { %v146_v47 = vadd.f32 %v135_v46, %v134_v45 }
  0x87   :  { %v147_v48 = vrot.slane %v146_v47, 4 }
  0x89   :  { %v148_v49 = vadd.f32 %v147_v48, %v146_v47 }
  0x8b   :  { %v149_v50 = vrot.slane %v148_v49, 2 }
  0x8d   :  { %v150_v51 = vadd.f32 %v149_v50, %v148_v49 }
  0x8f   :  { %v151_v52 = vrot.slane %v150_v51, 1 }
  0x91   :  { %v152_v53 = vadd.f32 %v151_v52, %v150_v51 }
  0x93   :  { %153 = vst [vmem:[#allocation3] sm:$0x1] %v152_v53 }
  0x94   :  { %164 = dma.vmem_to_hbm [thread:$0]  %s160_s1, 16, %s162_s19, [#allocation4]  }
  0x95   :  { %222 = dma.done.wait [#allocation4], 16  }
  0x96   :  { %223 = vsyncadd [#allocation4], 4294967280 }
  0x97   :  { %169 = vsyncpa [#allocation4], 1 }

</bundles_post_ra>
